<compile_context>
chip_gen: v7x
topology: tpu7x:2x2x1
jax: 0.10.0
libtpu: 0.0.40
codegen_flags: <defaults>
</compile_context>

<pallas_src>
import jax
import jax.numpy as jnp
from jax.experimental import pallas as pl
from jax.experimental.pallas import tpu as pltpu


def _chomp_copy_kernel(x_ref, o_ref):
    # x_ref: (TR, in_bl) VMEM tile; o_ref: (TR, bl) VMEM tile with bl <= in_bl.
    # When the BlockSpecs already performed the chomp (in_bl == bl) this is a
    # full-tile copy; in the small-l_out fallback it trims the tail in VMEM.
    o_ref[...] = x_ref[:, : o_ref.shape[1]]


def chomp1d(x: jax.Array, chomp_size: int) -> jax.Array:
    """Pallas equivalent of Chomp1d.forward: x[:, :, :-chomp_size]."""
    n, c, l = x.shape
    assert 0 <= chomp_size < l, "require 0 <= chomp_size < L"
    if chomp_size == 0:
        return x  # nothing to chomp

    l_out = l - chomp_size
    r = n * c
    x2 = x.reshape(r, l)  # free: (N, C, L) is row-contiguous.

    # Row tile: 512 rows (multiple of all sublane packing factors) or the full
    # row extent when smaller (full-dim blocks are always legal).
    tr = 512 if r > 512 else r

    # Time tile. The input block is either a multiple of 128 lanes or the
    # full input time dim, so the BlockSpec satisfies TPU tiling rules.
    if l_out >= 128:
        # Chomp via the BlockSpec: only the kept prefix is ever DMA'd.
        # Valid-output columns of every edge block map to valid-input columns
        # (l > l_out), so masked edge stores never see garbage.
        bl = min(1024, (l_out // 128) * 128)
        in_bl = bl
    elif l >= 128:
        # Tiny kept prefix: one lane-aligned 128-wide input window, trimmed
        # in-kernel (wasted DMA < 128 elems/row, within lane padding anyway).
        bl = l_out
        in_bl = 128
    else:
        # Whole time axis fits in one lane tile; use full-dim blocks.
        bl = l_out
        in_bl = l

    grid = (pl.cdiv(r, tr), pl.cdiv(l_out, bl))

    out2 = pl.pallas_call(
        _chomp_copy_kernel,
        out_shape=jax.ShapeDtypeStruct((r, l_out), x.dtype),
        grid_spec=pltpu.PrefetchScalarGridSpec(
            num_scalar_prefetch=0,
            grid=grid,
            in_specs=[pl.BlockSpec((tr, in_bl), lambda i, j: (i, j))],
            out_specs=pl.BlockSpec((tr, bl), lambda i, j: (i, j)),
        ),
        compiler_params=pltpu.CompilerParams(
            dimension_semantics=("parallel", "parallel"),
            vmem_limit_bytes=64 << 20,
        ),
    )(x2)

    return out2.reshape(n, c, l_out)


if __name__ == "__main__":
    key = jax.random.PRNGKey(0)

    # Small shape matching the module's (N, C, L) convention.
    N, C, L = 2, 4, 16
    chomp_size = 3
    x = jax.random.normal(key, (N, C, L), dtype=jnp.float32)

    y = chomp1d(x, chomp_size)
    jax.block_until_ready(y)
    y_ref = x[:, :, :-chomp_size]
    assert y.shape == (N, C, L - chomp_size)
    assert y.dtype == x.dtype
    assert jnp.array_equal(y, y_ref)

    # Exercise the 128-aligned BlockSpec-chomp path (multiple time tiles,
    # partial edge blocks on both rows and time).
    x2 = jax.random.normal(jax.random.PRNGKey(0), (2, 96, 400), dtype=jnp.float32)
    y2 = chomp1d(x2, 11)
    jax.block_until_ready(y2)
    assert jnp.array_equal(y2, x2[:, :, :-11])

    # Exercise the tiny-kept-prefix fallback (l_out < 128 <= L).
    x3 = jax.random.normal(jax.random.PRNGKey(0), (3, 5, 160), dtype=jnp.float32)
    y3 = chomp1d(x3, 100)
    jax.block_until_ready(y3)
    assert jnp.array_equal(y3, x3[:, :, :-100])

    print("KERNEL_OK")
</pallas_src>

<mosaic_0001>
module attributes {stable_mosaic.version = 11 : i64} {
  func.func @_chomp_copy_kernel(%arg0: i32, %arg1: i32, %arg2: memref<8x16xf32, #tpu.memory_space<vmem>>, %arg3: memref<8x13xf32, #tpu.memory_space<vmem>>) attributes {dimension_semantics = [#tpu.dimension_semantics<parallel>, #tpu.dimension_semantics<parallel>], iteration_bounds = array<i64: 1, 1>, scalar_prefetch = 0 : i64, scratch_operands = 0 : i64, tpu.core_type = #tpu.core_type<tc>, window_params = [{transform_indices = @transform_0, window_bounds = array<i64: 8, 16>}, {transform_indices = @transform_1, window_bounds = array<i64: 8, 13>}]} {
    %c0 = arith.constant 0 : index
    %c0_0 = arith.constant 0 : index
    %0 = vector.load %arg2[%c0, %c0_0] : memref<8x16xf32, #tpu.memory_space<vmem>>, vector<8x13xf32>
    %c0_1 = arith.constant 0 : index
    %c0_2 = arith.constant 0 : index
    %1 = vector.load %arg3[%c0_1, %c0_2] : memref<8x13xf32, #tpu.memory_space<vmem>>, vector<8x13xf32>
    tpu.vector_store %arg3[%c0_1, %c0_2], %0 {strides = array<i32>} : memref<8x13xf32, #tpu.memory_space<vmem>>, vector<8x13xf32>,
    return
  }
  func.func @transform_0(%arg0: i32, %arg1: i32) -> (i32, i32) {
    %c0_i32 = arith.constant 0 : i32
    return %arg0, %arg1 : i32, i32
  }
  func.func @transform_1(%arg0: i32, %arg1: i32) -> (i32, i32) {
    %c0_i32 = arith.constant 0 : i32
    return %arg0, %arg1 : i32, i32
  }
}

</mosaic_0001>

<bundles_post_ra>
// kernel: tpu_custom_call.1
= control target key start
LH: loop header
LB: loop body
LE: loop exit
PB: predicated region body
PF: predicated region fallthrough
CT: control target
= control target key end

     0   :  { %6 = vsyncpa [#allocation3], 0  ;;  %s125_s0 = inlined_call_operand.hbm [shape: f32[8,16], index: 0, kind: input, shape index: {}]   ;;  %s126_s1 = inlined_call_operand.hbm [shape: f32[8,13], index: 1, kind: output, shape index: {}]  }
   0x1   :  { %7 = vsyncpa [#allocation4], 0  ;;  %s89_s6 = smov [#allocation2]   ;;  %s41_s10 = scalar_lea.hbm %s125_s0, 128 }
   0x2   :  { %s14_s7 = sshll.u32 %s89_s6, 4  ;;  %p42_p0 = scmp.ne.s32.totalorder %s125_s0, %s41_s10  ;;  %s15_s7 = int_to_ptr.vmem [resolvable:$true] %s14_s7 }
   0x3   :  { %p45_p1 = scmp.lt.u32.totalorder %s41_s10, %s125_s0 }
   0x5   :  { %p47_p2 = pnand %p45_p1, %p42_p0 }
   0x7   :  { %50 = shalt.err (!%p47_p2)
}
   0x8   :  { %s51_s15 = scalar_lea.vmem %s15_s7, 128  ;;  %p56_p4 = scmp.lt.s32.totalorder %s15_s7, %s15_s7 }
   0x9   :  { %p52_p3 = scmp.ne.s32.totalorder %s15_s7, %s51_s15  ;;  %p57_p5 = scmp.lt.s32.totalorder %s51_s15, %s51_s15 }
   0xb   :  { %p58_p6 = por %p57_p5, %p56_p4 }
   0xd   :  { %p59_p7 = pnand %p58_p6, %p52_p3 }
   0xf   :  { %62 = shalt.err (!%p59_p7)
}
  0x10   :  { %17 = dma.hbm_to_vmem [thread:$0]  %s125_s0, 128, %s15_s7, [#allocation3]  }
  0x11   :  { %85 = dma.done.wait [#allocation3], 128  }
  0x12   :  { %86 = vsyncadd [#allocation3], 4294967168  ;;  %s90_s18 = smov [#allocation5]   ;;  %vm22_vm0 = vcmask 105472   ;;  %v21_v0 = vld [vmem:[#allocation2] sm:$0xff] }
  0x13   :  { %s30_s19 = sshll.u32 %s90_s18, 4  ;;  %23 = vst.msk [vmem:[#allocation5] sm:$0xff] %vm22_vm0, %v21_v0  ;;  %s31_s19 = int_to_ptr.vmem [resolvable:$true] %s30_s19 }
  0x14   :  { %s63_s20 = scalar_lea.vmem %s31_s19, 128  ;;  %p68_p9 = scmp.lt.s32.totalorder %s31_s19, %s31_s19 }
  0x15   :  { %p64_p8 = scmp.ne.s32.totalorder %s31_s19, %s63_s20  ;;  %p69_p10 = scmp.lt.s32.totalorder %s63_s20, %s63_s20 }
  0x17   :  { %p70_p11 = por %p69_p10, %p68_p9 }
  0x19   :  { %p71_p12 = pnand %p70_p11, %p64_p8 }
  0x1b   :  { %74 = shalt.err (!%p71_p12)
}
  0x1c   :  { %s75_s23 = scalar_lea.hbm %s126_s1, 128 }
  0x1d   :  { %p76_p13 = scmp.ne.s32.totalorder %s126_s1, %s75_s23  ;;  %p79_p0 = scmp.lt.u32.totalorder %s75_s23, %s126_s1 }
  0x1f   :  { %p81_p1 = pnand %p79_p0, %p76_p13 }
  0x21   :  { %84 = shalt.err (!%p81_p1)
}
  0x22   :  { %33 = dma.vmem_to_hbm [thread:$0]  %s31_s19, 128, %s126_s1, [#allocation4]  }
  0x23   :  { %87 = dma.done.wait [#allocation4], 128  }
  0x24   :  { %88 = vsyncadd [#allocation4], 4294967168 }
  0x25   :  { %37 = vsyncpa [#allocation3], 1 }
  0x26   :  { %38 = vsyncpa [#allocation4], 1 }

</bundles_post_ra>
